<compile_context>
chip_gen: v7x
topology: tpu7x:2x2x1
jax: 0.10.0
libtpu: 0.0.40
codegen_flags: <defaults>
</compile_context>

<pallas_src>
import jax
import jax.numpy as jnp
from jax.experimental import pallas as pl
from jax.experimental.pallas import tpu as pltpu

LANE = 128


def _round_up(v, m):
    return -(-v // m) * m


def _sublane(itemsize):
    # sublane packing granularity: 8 for f32, 16 for bf16, 32 for int8/fp8
    return max(8, 32 // itemsize)


def _pick_block_batch(b, sample_vmem_bytes, target_block_bytes):
    """Samples per grid step.

    Sized so one block's lane-padded VMEM footprint is ~target_block_bytes
    (MiB-scale DMAs amortize the ~0.35us per-step overhead), but always split
    into >= 2 grid blocks when the batch permits so the "parallel" batch axis
    can be sharded across both v7x TensorCores (v5e/v6e have 1 TC; the extra
    grid step is noise there)."""
    bb = max(1, int(target_block_bytes) // max(1, int(sample_vmem_bytes)))
    if b >= 2:
        bb = min(bb, -(-b // 2))          # force >= 2 blocks
    bb = min(bb, b)
    # keep blocks 8-aligned when actually splitting a larger batch so padded
    # tails stay small
    if b > 8 and bb > 8:
        bb = (bb // 8) * 8
    return max(1, bb)


def _l_exp_kernel(mean_ref, x_ref, pw_ref, pch_t_ref, o_ref):
    """One grid step: BB samples -> per-sample sum of squared exposure error.

    mean_ref  : (1, 1) f32 in SMEM     -- target exposure level
    x_ref     : (BB, C*H, W) block     -- contiguous NCHW slab, W on lanes
    pw_ref    : (W, Wp)   0/1          -- pools W   -> Wp   (input dtype)
    pch_t_ref : (Hp, C*H) 0/1 f32      -- pools C,H -> Hp
    o_ref     : (1, 1, BB)             -- per-sample sum((pooled - mean)^2)
    """
    bb, ch, w = x_ref.shape
    wp = pw_ref.shape[-1]
    hp = pch_t_ref.shape[0]

    x = x_ref[...]                                                  # input dtype, no upcast

    # --- W pooling: batched MXU matmul against the tiny 0/1 (W, Wp) matrix,
    # broadcast over the block ('bmk,bkn' is the well-supported batched form).
    # Operands stay in the input dtype; accumulation is f32.
    pw_b = jnp.broadcast_to(pw_ref[...][None], (bb, w, wp))
    y = jnp.einsum('bkw,bwq->bkq', x, pw_b,
                   preferred_element_type=jnp.float32)              # (bb, C*H, Wp) f32

    # --- (C, H) pooling: batched matmul with the 0/1 (Hp, C*H) matrix.
    pch_b = jnp.broadcast_to(pch_t_ref[...][None], (bb, hp, ch))    # f32
    pooled = jnp.einsum('bhk,bkq->bhq', pch_b, y,
                        preferred_element_type=jnp.float32)         # (bb, Hp, Wp) f32

    # --- exposure error.  1/(C*patch^2) == Hp*Wp/(C*H*W); applied after the
    # matmuls so the pooling matrices stay exact 0/1 (lossless in bf16).
    scale = jnp.float32(hp * wp) / jnp.float32(ch * w)
    diff = pooled * scale - mean_ref[0, 0]
    o_ref[...] = jnp.sum(diff * diff, axis=(1, 2)).reshape(1, 1, bb)


def l_exp(x, patch_size, mean_val, *, target_block_bytes=12 << 20):
    """Pallas implementation of L_exp.forward. Returns a scalar f32.

    target_block_bytes: lane-padded bytes of x per grid step. Default 12 MiB
    suits v6e/v7x (raise toward 16 MiB on v7x, drop to 4-8 MiB on v5e if
    desired); vmem_limit_bytes is derived from the actual footprint."""
    b, c, h, w = x.shape
    assert h % patch_size == 0 and w % patch_size == 0
    hp, wp = h // patch_size, w // patch_size
    ch = c * h

    if not jnp.issubdtype(x.dtype, jnp.floating):
        x = x.astype(jnp.float32)
    dtype = x.dtype
    itemsize = jnp.dtype(dtype).itemsize
    sub = _sublane(itemsize)

    # (B, C, H, W) -> (B, C*H, W): free metadata reshape.  HBM reads stay
    # fully contiguous and W sits on the lane axis for the first matmul.
    x3 = x.reshape(b, ch, w)

    # lane/sublane-padded VMEM footprint of one sample's (C*H, W) slab
    sample_vmem = _round_up(ch, sub) * _round_up(w, LANE) * itemsize
    bb = _pick_block_batch(b, sample_vmem, target_block_bytes)
    nb = pl.cdiv(b, bb)
    b_pad = nb * bb
    if b_pad != b:
        # Padded rows pool to 0 and contribute hp*wp*mean^2 each; they are
        # sliced off before the final mean below (keep that invariant if the
        # epilogue ever changes).
        x3 = jnp.pad(x3, ((0, b_pad - b), (0, 0), (0, 0)))

    # Factorized 0/1 pooling matrices (exact in any float dtype):
    #   pw[w, q]    = 1  iff  w // patch == q           (W   -> Wp)
    #   pch_t[i, k] = 1  iff  (k % H) // patch == i     (C*H -> Hp, summed over C)
    pw = jnp.repeat(jnp.eye(wp, dtype=dtype), patch_size, axis=0)         # (W, Wp)
    ph = jnp.repeat(jnp.eye(hp, dtype=jnp.float32), patch_size, axis=0)   # (H, Hp)
    pch_t = jnp.tile(ph, (c, 1)).T                                        # (Hp, C*H) f32

    mean_arr = jnp.full((1, 1), jnp.float32(mean_val))

    # --- VMEM budget: double-buffered x block + resident constants + f32
    # intermediates of the two matmuls (incl. broadcast pooling operands).
    x_block_vmem = bb * sample_vmem
    pwb_vmem = bb * _round_up(w, sub) * _round_up(wp, LANE) * itemsize
    y_vmem = bb * _round_up(ch, 8) * _round_up(wp, LANE) * 4
    pchb_vmem = bb * _round_up(hp, 8) * _round_up(ch, LANE) * 4
    pooled_vmem = bb * _round_up(hp, 8) * _round_up(wp, LANE) * 4
    const_vmem = 2 * (_round_up(w, sub) * _round_up(wp, LANE) * itemsize
                      + _round_up(hp, 8) * _round_up(ch, LANE) * 4)
    vmem_est = (2 * x_block_vmem
                + pwb_vmem + y_vmem + pchb_vmem + pooled_vmem
                + const_vmem + (1 << 20))          # headroom for compiler scratch
    vmem_limit_bytes = int(min(max(32 << 20, 2 * vmem_est), 112 << 20))

    per_block = pl.pallas_call(
        _l_exp_kernel,
        out_shape=jax.ShapeDtypeStruct((nb, 1, bb), jnp.float32),
        grid_spec=pltpu.PrefetchScalarGridSpec(
            num_scalar_prefetch=0,
            grid=(nb,),
            in_specs=[
                # target exposure as an SMEM scalar (no recompile per mean_val)
                pl.BlockSpec(memory_space=pltpu.MemorySpace.SMEM),
                # BB samples per grid step; last two block dims == full dims
                pl.BlockSpec((bb, ch, w), lambda i: (i, 0, 0)),
                # tiny pooling constants: constant block index -> DMA'd once,
                # stay resident (KB-scale, so double-buffering them is free)
                pl.BlockSpec((w, wp), lambda i: (0, 0)),
                pl.BlockSpec((hp, ch), lambda i: (0, 0)),
            ],
            # lane-dense per-block partials, indexed by grid step -> no
            # resident accumulator, batch axis stays "parallel"
            out_specs=pl.BlockSpec((1, 1, bb), lambda i: (i, 0, 0)),
        ),
        compiler_params=pltpu.CompilerParams(
            dimension_semantics=("parallel",),     # megacore / both v7x TCs
            vmem_limit_bytes=vmem_limit_bytes,
        ),
    )(mean_arr, x3, pw, pch_t)

    # Final tiny reduction + normalization in plain JAX (padded rows dropped).
    per_sample = per_block.reshape(nb * bb)[:b]
    return jnp.sum(per_sample) / jnp.float32(b * hp * wp)


def l_exp_ref(x, patch_size, mean_val):
    """Pure-JAX reference matching the PyTorch semantics."""
    b, c, h, w = x.shape
    hp, wp = h // patch_size, w // patch_size
    xm = jnp.mean(x.astype(jnp.float32), axis=1, keepdims=True)           # (B,1,H,W)
    pooled = xm.reshape(b, 1, hp, patch_size, wp, patch_size).mean(axis=(3, 5))
    return jnp.mean((pooled - mean_val) ** 2)


if __name__ == "__main__":
    # Module "parameters": patch_size and mean_val from __init__.
    patch_size = 4
    mean_val = 0.6

    key = jax.random.PRNGKey(0)

    # 1) main check: small f32 NCHW input
    x = jax.random.uniform(key, (2, 4, 16, 16), dtype=jnp.float32)
    d = jax.block_until_ready(l_exp(x, patch_size, mean_val))
    d_ref = l_exp_ref(x, patch_size, mean_val)
    assert jnp.allclose(d, d_ref, rtol=1e-4, atol=1e-6), (d, d_ref)

    # 2) bf16 input path (no in-kernel upcast, native bf16 MXU operands)
    x_bf16 = x.astype(jnp.bfloat16)
    d_bf = jax.block_until_ready(l_exp(x_bf16, patch_size, mean_val))
    d_bf_ref = l_exp_ref(x_bf16.astype(jnp.float32), patch_size, mean_val)
    assert jnp.allclose(d_bf, d_bf_ref, rtol=1e-2, atol=1e-4), (d_bf, d_bf_ref)

    # 3) multi-block + batch-padding path (bb > 1, nb = 2, one padded row)
    key2 = jax.random.PRNGKey(0)
    x2 = jax.random.uniform(key2, (5, 3, 16, 16), dtype=jnp.float32)
    d2 = jax.block_until_ready(l_exp(x2, patch_size, mean_val))
    d2_ref = l_exp_ref(x2, patch_size, mean_val)
    assert jnp.allclose(d2, d2_ref, rtol=1e-4, atol=1e-6), (d2, d2_ref)

    print("KERNEL_OK")
</pallas_src>

<mosaic_0001>
module attributes {stable_mosaic.version = 11 : i64} {
  func.func @_l_exp_kernel(%arg0: i32, %arg1: memref<1x1xf32, #tpu.memory_space<smem>>, %arg2: memref<1x64x16xf32, #tpu.memory_space<vmem>>, %arg3: memref<16x4xf32, #tpu.memory_space<vmem>>, %arg4: memref<4x64xf32, #tpu.memory_space<vmem>>, %arg5: memref<1x1x1xf32, #tpu.memory_space<vmem>>) attributes {dimension_semantics = [#tpu.dimension_semantics<parallel>], iteration_bounds = array<i64: 2>, scalar_prefetch = 0 : i64, scratch_operands = 0 : i64, tpu.core_type = #tpu.core_type<tc>, window_params = [{transform_indices = @transform_0, window_bounds = array<i64: 1, 1>}, {transform_indices = @transform_1, window_bounds = array<i64: 1, 64, 16>}, {pipeline_mode = #tpu.pipeline_mode<synchronous>, transform_indices = @transform_2, window_bounds = array<i64: 16, 4>}, {pipeline_mode = #tpu.pipeline_mode<synchronous>, transform_indices = @transform_3, window_bounds = array<i64: 4, 64>}, {transform_indices = @transform_4, window_bounds = array<i64: 1, 1, 1>}]} {
    %c0 = arith.constant 0 : index
    %c0_0 = arith.constant 0 : index
    %c0_1 = arith.constant 0 : index
    %0 = vector.load %arg2[%c0, %c0_0, %c0_1] : memref<1x64x16xf32, #tpu.memory_space<vmem>>, vector<1x64x16xf32>
    %c0_2 = arith.constant 0 : index
    %c0_3 = arith.constant 0 : index
    %1 = vector.load %arg3[%c0_2, %c0_3] : memref<16x4xf32, #tpu.memory_space<vmem>>, vector<16x4xf32>
    %2 = vector.shape_cast %1 : vector<16x4xf32> to vector<1x16x4xf32>
    "tpu.trace_start"() <{level = 10 : i32, message = "bkw,bwq->bkq"}> : () -> ()
    %cst = arith.constant dense<0.000000e+00> : vector<1x64x4xf32>
    %3 = tpu.matmul %0, %2, %cst {dimension_numbers = #tpu.dot_dimension_numbers<[2], [1], [1], [2], [0, 0, 0, 1, 1, 2], [0], [0]>} : vector<1x64x16xf32>, vector<1x16x4xf32>, vector<1x64x4xf32> -> vector<1x64x4xf32>
    "tpu.trace_stop"() : () -> ()
    %c0_4 = arith.constant 0 : index
    %c0_5 = arith.constant 0 : index
    %4 = vector.load %arg4[%c0_4, %c0_5] : memref<4x64xf32, #tpu.memory_space<vmem>>, vector<4x64xf32>
    %5 = vector.shape_cast %4 : vector<4x64xf32> to vector<1x4x64xf32>
    "tpu.trace_start"() <{level = 10 : i32, message = "bhk,bkq->bhq"}> : () -> ()
    %cst_6 = arith.constant dense<0.000000e+00> : vector<1x4x4xf32>
    %6 = tpu.matmul %5, %3, %cst_6 {dimension_numbers = #tpu.dot_dimension_numbers<[2], [1], [1], [2], [0, 0, 0, 1, 1, 2], [0], [0]>} : vector<1x4x64xf32>, vector<1x64x4xf32>, vector<1x4x4xf32> -> vector<1x4x4xf32>
    "tpu.trace_stop"() : () -> ()
    %cst_7 = arith.constant 1.600000e+01 : f32
    %cst_8 = arith.constant 1.024000e+03 : f32
    %7 = arith.divf %cst_7, %cst_8 : f32
    %8 = vector.broadcast %7 : f32 to vector<1x4x4xf32>
    %9 = arith.mulf %6, %8 : vector<1x4x4xf32>
    %c0_9 = arith.constant 0 : index
    %c0_10 = arith.constant 0 : index
    %10 = memref.load %arg1[%c0_9, %c0_10] : memref<1x1xf32, #tpu.memory_space<smem>>
    %11 = vector.broadcast %10 : f32 to vector<1x4x4xf32>
    %12 = arith.subf %9, %11 : vector<1x4x4xf32>
    %13 = arith.mulf %12, %12 : vector<1x4x4xf32>
    %cst_11 = arith.constant dense<0.000000e+00> : vector<1xf32>
    %14 = vector.multi_reduction <add>, %13, %cst_11 [1, 2] : vector<1x4x4xf32> to vector<1xf32>
    %15 = vector.shape_cast %14 : vector<1xf32> to vector<1x1x1xf32>
    %c0_12 = arith.constant 0 : index
    %c0_13 = arith.constant 0 : index
    %c0_14 = arith.constant 0 : index
    %16 = vector.load %arg5[%c0_12, %c0_13, %c0_14] : memref<1x1x1xf32, #tpu.memory_space<vmem>>, vector<1x1x1xf32>
    tpu.vector_store %arg5[%c0_12, %c0_13, %c0_14], %15 {strides = array<i32>} : memref<1x1x1xf32, #tpu.memory_space<vmem>>, vector<1x1x1xf32>,
    return
  }
  func.func @transform_0(%arg0: i32) -> (i32, i32) {
    %c0_i32 = arith.constant 0 : i32
    %c0_i32_0 = arith.constant 0 : i32
    %c0_i32_1 = arith.constant 0 : i32
    return %c0_i32, %c0_i32_0 : i32, i32
  }
  func.func @transform_1(%arg0: i32) -> (i32, i32, i32) {
    %c0_i32 = arith.constant 0 : i32
    %c0_i32_0 = arith.constant 0 : i32
    %c0_i32_1 = arith.constant 0 : i32
    return %arg0, %c0_i32, %c0_i32_0 : i32, i32, i32
  }
  func.func @transform_2(%arg0: i32) -> (i32, i32) {
    %c0_i32 = arith.constant 0 : i32
    %c0_i32_0 = arith.constant 0 : i32
    %c0_i32_1 = arith.constant 0 : i32
    return %c0_i32, %c0_i32_0 : i32, i32
  }
  func.func @transform_3(%arg0: i32) -> (i32, i32) {
    %c0_i32 = arith.constant 0 : i32
    %c0_i32_0 = arith.constant 0 : i32
    %c0_i32_1 = arith.constant 0 : i32
    return %c0_i32, %c0_i32_0 : i32, i32
  }
  func.func @transform_4(%arg0: i32) -> (i32, i32, i32) {
    %c0_i32 = arith.constant 0 : i32
    %c0_i32_0 = arith.constant 0 : i32
    %c0_i32_1 = arith.constant 0 : i32
    return %arg0, %c0_i32, %c0_i32_0 : i32, i32, i32
  }
}

</mosaic_0001>

<bundles_post_ra>
// kernel: tpu_custom_call.1
= control target key start
LH: loop header
LB: loop body
LE: loop exit
PB: predicated region body
PF: predicated region fallthrough
CT: control target
= control target key end

     0   :  { %s613_s17 = smov 0   ;;  %s651_s0 = inlined_call_operand.<no memory space> [shape: f32[1,1], index: 0, kind: input, shape index: {}]   ;;  %s652_s1 = inlined_call_operand.vmem [shape: f32[2,64,16], index: 1, kind: input, shape index: {}]   ;;  %s653_s2 = inlined_call_operand.vmem [shape: f32[16,4], index: 2, kind: input, shape index: {}]   ;;  %s654_s3 = inlined_call_operand.vmem [shape: f32[4,64], index: 3, kind: input, shape index: {}]   ;;  %s655_s4 = inlined_call_operand.vmem [shape: f32[2,1,1], index: 4, kind: output, shape index: {}]  }
   0x1   :  { %9 = sst [smem:[#allocation2]] %s651_s0 }
   0x2 LB: > { %s474_s18 = sadd.s32 4294967295, %s580_s17   ;;  %p478_p0 = scmp.ge.s32.totalorder %s580_s17, 1  ;;  %s580_s17 = sphi %s613_s17, %s15_s17  }
   0x3   : > { %p163_p1 = scmp.lt.s32.totalorder %s580_s17, 3 }
   0x5   : > { %p164_p2 = pnand %p478_p0, %p163_p1 }
   0x6   : > { %v203_v0 = vld [vmem:[%s653_s2] sm:$0xff] (!%p164_p2)  ;;  %v204_v1 = vld [vmem:[%s653_s2 + $0x8] sm:$0xff] (!%p164_p2)  ;;  %p187_p3 = scmp.lt.s32.totalorder (!%p164_p2), %s474_s18, 1  ;;  %vm205_vm0 = vcmask (!%p164_p2), 130048   ;;  %v582_v11 = vmov (!%p164_p2), 0.0|0.0   ;;  %vm583_vm1 = vmmov (!%p164_p2), 0  }
   0x7   : > { %167 = sbr.rel (%p164_p2) target bundleno = 623 (0x26f), region = 36  ;;  %v547_v2 = vpack.c.bf16 (!%p164_p2), %v204_v1, %v203_v0  ;;  %551 = vmatprep.subr.bf16.mxu1 (!%p164_p2), %v582_v11  ;;  %v584_v12 = vmov (!%p164_p2), 0.0   ;;  %v335_v25 = vld [vmem:[%s654_s3] sm:$0xf] (!%p164_p2)  ;;  %vm336_vm2 = vcmask (!%p164_p2), 523264   ;;  %s411_s28 = sld [smem:[#allocation2]] (!%p164_p2) }
   0x8   : > { %544 = vmatprep.mubr.msk.f32.mxu1 (!%p164_p2), %vm583_vm1, %v584_v12  ;;  %vm415_vm3 = vcmask (!%p164_p2), 27648   ;;  %vm425_vm4 = vcmask (!%p164_p2), 0  }
   0x9   : > { %548 = vmatprep.subr.bf16.mxu0 (!%p164_p2), %v547_v2 }
   0xa   : > { %550 = vmatpush3.bf16.msra.mxu0 (!%p164_p2), %v547_v2 }
   0xd   : > { %v412_v27 = vstv (!%p164_p2), %s411_s28 }
   0xe   : > { %s657_s18 = smov (!%p187_p3, %s474_s18), 1 }
   0xf   : > { %s492_s22 = sshll.u32 %s657_s18, 6  ;;  %s194_s5 = scalar_lea.vmem %s655_s4, %s657_s18 }
  0x10   : > { %s191_s25 = scalar_lea.vmem %s652_s1, %s492_s22 }
  0x11   : > { %v195_v3 = vld [vmem:[%s191_s25] sm:$0xff]  ;;  %v196_v4 = vld [vmem:[%s191_s25 + $0x8] sm:$0xff]  ;;  %v197_v5 = vld [vmem:[%s191_s25 + $0x10] sm:$0xff] }
  0x12   : > { %516 = vmatprep.mubr.msk.f32.mxu0 %vm205_vm0, %v195_v3  ;;  %v198_v6 = vld [vmem:[%s191_s25 + $0x18] sm:$0xff]  ;;  %v199_v7 = vld [vmem:[%s191_s25 + $0x20] sm:$0xff]  ;;  %v200_v8 = vld [vmem:[%s191_s25 + $0x28] sm:$0xff] }
  0x13   : > { %517 = vmatmul.mubr.msk.f32.vlgmr.msra.gmra.mrb[0].mxu0 %vm205_vm0, %v196_v4  ;;  %v201_v9 = vld [vmem:[%s191_s25 + $0x30] sm:$0xff]  ;;  %v202_v10 = vld [vmem:[%s191_s25 + $0x38] sm:$0xff] }
  0x14   : > { %519 = vmatprep.mubr.msk.f32.mxu0 %vm205_vm0, %v197_v5 }
  0x17   : > { %520 = vmatmul.mubr.msk.f32.gmra.mrb[2].mxu0 %vm205_vm0, %v198_v6 }
  0x18   : > { %522 = vmatprep.mubr.msk.f32.mxu0 %vm205_vm0, %v199_v7 }
  0x1b   : > { %523 = vmatmul.mubr.msk.f32.gmra.mrb[4].mxu0 %vm205_vm0, %v200_v8 }
  0x1c   : > { %525 = vmatprep.mubr.msk.f32.mxu0 %vm205_vm0, %v201_v9 }
  0x1f   : > { %526 = vmatmul.mubr.msk.f32.gmra.mrb[6].mxu0 %vm205_vm0, %v202_v10 }
  0xe6   : > { %v518_v13 = vpop.f32.mrb[0].mxu0 }
  0xe7   : > { %v296_v14 = vpop.f32.mrb[1].mxu0 }
  0xe8   : > { %v552_v15 = vpack.c.bf16 %v518_v13, %v296_v14 }
  0xea   : > { %v521_v16 = vpop.f32.mrb[2].mxu0  ;;  %553 = vmatpush3.bf16.msra.mxu1 %v552_v15 }
  0xeb   : > { %v306_v17 = vpop.f32.mrb[3].mxu0  ;;  %554 = vmatprep.subr.bf16.mxu1 %v582_v11 }
  0xec   : > { %v555_v18 = vpack.c.bf16 %v521_v16, %v306_v17 }
  0xee   : > { %v524_v19 = vpop.f32.mrb[4].mxu0  ;;  %556 = vmatpush3.bf16.msra.mxu1 %v555_v18 }
  0xef   : > { %v316_v20 = vpop.f32.mrb[5].mxu0  ;;  %557 = vmatprep.subr.bf16.mxu1 %v582_v11 }
  0xf0   : > { %v558_v21 = vpack.c.bf16 %v524_v19, %v316_v20 }
  0xf2   : > { %v527_v22 = vpop.f32.mrb[6].mxu0  ;;  %559 = vmatpush3.bf16.msra.mxu1 %v558_v21 }
  0xf3   : > { %v326_v23 = vpop.f32.mrb[7].mxu0  ;;  %560 = vmatprep.subr.bf16.mxu1 %v582_v11 }
  0xf4   : > { %v561_v24 = vpack.c.bf16 %v527_v22, %v326_v23 }
  0xf6   : > { %562 = vmatpush3.bf16.msra.mxu1 %v561_v24 }
  0xf9   : > { %545 = vmatmul.mubr.msk.f32.vlgmr.msra.gmra.mrb[0].mxu1 %vm336_vm2, %v335_v25 }
 0x1cc   : > { %v406_v26 = vpop.f32.mrb[0].mxu1 }
 0x1cd   : > { %v410_v28 = vmul.f32 0.015625, %v406_v26  ;;  %v546_v29 = vpop.f32.mrb[1].mxu1 }
 0x1cf   : > { %v413_v30 = vsub.f32 %v410_v28, %v412_v27 }
 0x1d1   : > { %v414_v31 = vmul.f32 %v413_v30, %v413_v30 }
 0x1d3   : > { %v416_v32 = vsel %vm415_vm3, %v414_v31, 0.0 }
 0x1d4   : > { %417 = vadd.xlane.f32.xlu0 %v416_v32 }
 0x261   : > { %v418_v33 = vpop.xlane.xlu0 %417 }
 0x262   : > { %v419_v34 = vrot.slane %v418_v33, 4 }
 0x264   : > { %v420_v35 = vadd.f32 %v419_v34, %v418_v33 }
 0x266   : > { %v421_v36 = vrot.slane %v420_v35, 2 }
 0x268   : > { %v422_v37 = vadd.f32 %v421_v36, %v420_v35 }
 0x26a   : > { %v423_v38 = vrot.slane %v422_v37, 1 }
 0x26c   : > { %v424_v39 = vadd.f32 %v423_v38, %v422_v37 }
 0x26e   : > { %426 = vst.msk [vmem:[%s194_s5] sm:$0x1] %vm425_vm4, %v424_v39 }
 0x26f PF: > { %s15_s17 = sadd.s32 1, %s580_s17  }
 0x270   : > { %p12_p4 = scmp.ge.s32.totalorder %s15_s17, 4  }
 0x272   :  { %14 = sbr.rel (!%p12_p4) target bundleno = 2 (0x2), region = 66 }

</bundles_post_ra>
